<compile_context>
chip_gen: v5e
topology: v5e:2x2
jax: 0.10.0
libtpu: 0.0.40
codegen_flags: <defaults>
</compile_context>

<pallas_src>
import numpy as np
import jax
import jax.numpy as jnp
from jax.experimental import pallas as pl
from jax.experimental.pallas import tpu as pltpu


# ----------------------------- kernel ----------------------------------------

def _autoenc_kernel(x_ref, w1_ref, b1_ref, w2_ref, b2_ref,
                    d1_ref, db1_ref, d2_ref, db2_ref, m_ref, out_ref):
    W = x_ref.shape[-1]                   # lanes = tb * L (batch-on-lanes)
    cd = w1_ref.dtype                     # MXU operand dtype (bf16 or f32)

    m_l0 = m_ref[0:1, :]                  # 0 where l == 0      (left zero-pad)
    m_r1 = m_ref[1:2, :]                  # 0 where l == L-1    (right pad, conv1)
    m_r2 = m_ref[2:3, :]                  # 0 where l == L-2    (right pad, conv2)
    m_s4 = m_ref[3:4, :]                  # 1 where l % 4 == 0  (valid after pool2)
    m_s2 = m_ref[4:5, :]                  # 1 where l % 2 == 0  (valid after convT1)

    def mxu(a, b):                        # channel-mixing dot, f32 accumulation
        return jnp.dot(a.astype(cd), b.astype(cd),
                       preferred_element_type=jnp.float32)

    def conv3(h, w_ref, b_ref, s, m_next):
        # k=3, padding=1 conv on columns valid at stride s (single fused dot).
        h_prev = pltpu.roll(h, s, axis=1) * m_l0          # h[:, l-s], 0 at left edge
        h_next = pltpu.roll(h, W - s, axis=1) * m_next    # h[:, l+s], 0 at right edge
        stacked = jnp.concatenate([h_prev, h, h_next], axis=0)   # (3*Ci, W)
        return mxu(w_ref[...], stacked) + b_ref[...]

    def pool2(h, s):
        # MaxPool1d(2) on columns valid at stride s -> valid at stride 2*s.
        return jnp.maximum(h, pltpu.roll(h, W - s, axis=1))

    def convT(h, d_ref, b_ref, s_out):
        # ConvTranspose1d(k=2, stride=2): input valid (zero elsewhere) at stride
        # 2*s_out -> output valid at stride s_out.
        return (mxu(d_ref[0], h)
                + pltpu.roll(mxu(d_ref[1], h), s_out, axis=1)
                + b_ref[...])

    x = x_ref[...]                                               # (2, W)   stride 1
    h = jnp.maximum(conv3(x, w1_ref, b1_ref, 1, m_r1), 0.0)      # (16, W)  stride 1
    h = pool2(h, 1)                                              # (16, W)  stride 2
    h = jnp.maximum(conv3(h, w2_ref, b2_ref, 2, m_r2), 0.0)      # (8, W)   stride 2
    h = pool2(h, 2) * m_s4                                       # (8, W)   stride 4 (encoded)
    h = jnp.maximum(convT(h, d1_ref, db1_ref, 2), 0.0)           # (16, W)  stride 2
    h = convT(h * m_s2, d2_ref, db2_ref, 1)                      # (2, W)   stride 1

    # Numerically-stable sigmoid; the divide lands on the EUP (approx rcp).
    z = jnp.exp(-jnp.abs(h))
    sig = jnp.where(h >= 0.0, 1.0, z) * pl.reciprocal(1.0 + z, approx=True)
    out_ref[...] = sig.astype(out_ref.dtype)


# ----------------------------- host-side constant builders -------------------

def _fuse_conv_w(w, dtype):
    # PyTorch Conv1d weight (Cout, Cin, K=3) -> (Cout, 3*Cin), tap-major columns
    # (matches the [h_prev; h; h_next] sublane stacking inside the kernel).
    Co, Ci, K = w.shape
    return jnp.transpose(w, (0, 2, 1)).reshape(Co, K * Ci).astype(dtype)


def _convT_taps(w, dtype):
    # PyTorch ConvTranspose1d weight (Cin, Cout, K=2) -> (K, Cout, Cin).
    return jnp.transpose(w, (2, 1, 0)).astype(dtype)


def _bias_col(b):
    # (Co,) -> (Co, 1): broadcasts over the lane (batch*length) axis.
    return jnp.reshape(b, (-1, 1)).astype(jnp.float32)


def _boundary_masks(L, tb):
    # Five resident 0/1 rows, shape (5, tb*L): conv halo zero-padding and the
    # stride-4 / stride-2 "valid column" masks applied before the ConvT dots.
    Wl = tb * L
    l = np.arange(Wl) % L
    m = np.ones((5, Wl), np.float32)
    m[0, l == 0] = 0.0
    m[1, l == L - 1] = 0.0
    m[2, l == L - 2] = 0.0
    m[3] = (l % 4 == 0).astype(np.float32)
    m[4] = (l % 2 == 0).astype(np.float32)
    return jnp.asarray(m)


def _pick_tb(n, L, target_lanes=512):
    """Samples per grid step.  Prefer: >=2 grid steps (both v7x TensorCores),
    lane width a multiple of 128 (lane-dense loads/stores), lane width capped
    to bound in-kernel live ranges."""
    divs = [d for d in range(1, n + 1) if n % d == 0]
    cands = [d for d in divs if n // d >= 2] or divs
    good = [d for d in cands if (d * L) % 128 == 0 and d * L <= target_lanes]
    if good:
        return max(good)
    good = [d for d in cands if (d * L) % 128 == 0]
    if good:
        return min(good)
    return n   # full batch in one block: block == full array, always legal


# ----------------------------- wrapper ---------------------------------------

def cnn_autoencoder_forward(x_ncl, params, tb=None, compute_dtype=jnp.bfloat16,
                            target_lanes=512):
    """x_ncl: (N, 2, L) float32 (PyTorch NCL layout), L divisible by 4."""
    N, C, L = x_ncl.shape
    assert C == 2 and L % 4 == 0
    if tb is None:
        tb = _pick_tb(N, L, target_lanes)
    assert N % tb == 0

    w1, b1, w2, b2, dw1, db1, dw2, db2 = params

    W1, B1 = _fuse_conv_w(w1, compute_dtype), _bias_col(b1)   # (16, 6),  (16, 1)
    W2, B2 = _fuse_conv_w(w2, compute_dtype), _bias_col(b2)   # (8, 48),  (8, 1)
    D1, DB1 = _convT_taps(dw1, compute_dtype), _bias_col(db1) # (2,16,8), (16, 1)
    D2, DB2 = _convT_taps(dw2, compute_dtype), _bias_col(db2) # (2,2,16), (2, 1)
    M = _boundary_masks(L, tb)                                # (5, tb*L) f32

    consts = (W1, B1, W2, B2, D1, DB1, D2, DB2, M)

    # (N, 2, L) -> (2, N*L): channels on sublanes, batch*length on lanes.
    x2 = jnp.transpose(x_ncl, (1, 0, 2)).reshape(2, N * L).astype(jnp.float32)

    Wl = tb * L

    def const_spec(a):
        return pl.BlockSpec(a.shape, lambda i, _nd=a.ndim: (0,) * _nd)

    # Advisory cost: only the channel-mixing matmuls (structure is XLU/VPU work).
    flops = int(N * L * (2 * 16 * 6 + 2 * 8 * 48 + 2 * 2 * 16 * 8 + 2 * 2 * 2 * 16))
    const_bytes = sum(int(a.size * a.dtype.itemsize) for a in consts)
    cost = pl.CostEstimate(flops=flops, transcendentals=int(2 * N * L),
                           bytes_accessed=int(2 * 4 * 2 * N * L + const_bytes))

    out = pl.pallas_call(
        _autoenc_kernel,
        out_shape=jax.ShapeDtypeStruct((2, N * L), jnp.float32),
        grid=(N // tb,),
        in_specs=[pl.BlockSpec((2, Wl), lambda i: (0, i))]
                 + [const_spec(c) for c in consts],
        out_specs=pl.BlockSpec((2, Wl), lambda i: (0, i)),
        compiler_params=pltpu.CompilerParams(
            dimension_semantics=("parallel",),
            vmem_limit_bytes=32 * 1024 * 1024),
        cost_estimate=cost,
    )(x2, *consts)

    # TODO(synk): optionally emit bf16 output (halves writeback) if downstream tolerates it.
    return jnp.transpose(out.reshape(2, N, L), (1, 0, 2))


# ----------------------------- deterministic params --------------------------

def init_params(key):
    ks = jax.random.split(key, 8)

    def u(k, shape, fan_in):
        bound = 1.0 / np.sqrt(fan_in)
        return jax.random.uniform(k, shape, jnp.float32, -bound, bound)

    w1 = u(ks[0], (16, 2, 3), 2 * 3)     # Conv1d(2, 16, k=3): (Cout, Cin, K)
    b1 = u(ks[1], (16,), 2 * 3)
    w2 = u(ks[2], (8, 16, 3), 16 * 3)    # Conv1d(16, 8, k=3)
    b2 = u(ks[3], (8,), 16 * 3)
    dw1 = u(ks[4], (8, 16, 2), 16 * 2)   # ConvTranspose1d(8, 16, k=2): (Cin, Cout, K)
    db1 = u(ks[5], (16,), 16 * 2)
    dw2 = u(ks[6], (16, 2, 2), 2 * 2)    # ConvTranspose1d(16, 2, k=2)
    db2 = u(ks[7], (2,), 2 * 2)
    return (w1, b1, w2, b2, dw1, db1, dw2, db2)


# ----------------------------- numpy reference (PyTorch semantics, NCL) ------

def reference_forward(x_ncl, params):
    w1, b1, w2, b2, dw1, db1, dw2, db2 = [np.asarray(p) for p in params]
    x = np.asarray(x_ncl)

    def conv1d(x, w, b):                    # x: (N,Cin,L), w: (Cout,Cin,3), pad=1
        N, Cin, L = x.shape
        xp = np.pad(x, ((0, 0), (0, 0), (1, 1)))
        y = np.zeros((N, w.shape[0], L), np.float32)
        for k in range(3):
            y += np.einsum('ncl,oc->nol', xp[:, :, k:k + L], w[:, :, k])
        return y + b[None, :, None]

    def maxpool2(x):
        N, C, L = x.shape
        return x.reshape(N, C, L // 2, 2).max(axis=-1)

    def convT(x, w, b):                     # x: (N,Cin,L), w: (Cin,Cout,2), stride 2
        N, Cin, L = x.shape
        y = np.zeros((N, w.shape[1], 2 * L), np.float32)
        for k in range(2):
            y[:, :, k::2] = np.einsum('ncl,co->nol', x, w[:, :, k])
        return y + b[None, :, None]

    relu = lambda v: np.maximum(v, 0.0)
    h = relu(conv1d(x, w1, b1))
    h = maxpool2(h)
    h = relu(conv1d(h, w2, b2))
    h = maxpool2(h)
    h = relu(convT(h, dw1, db1))
    h = convT(h, dw2, db2)
    return 1.0 / (1.0 + np.exp(-h))


# ----------------------------- main ------------------------------------------

if __name__ == "__main__":
    key = jax.random.PRNGKey(0)
    pkey, xkey = jax.random.split(key)
    params = init_params(pkey)

    N, L = 16, 32                                   # (N, 2, L); tb=8 -> 256 lanes, grid=(2,)
    x = jax.random.normal(xkey, (N, 2, L), jnp.float32)
    ref = reference_forward(x, params)

    # bf16 MXU operands (v6e/v7x recommendation), f32 accumulation.
    out_bf16 = jax.block_until_ready(
        cnn_autoencoder_forward(x, params, compute_dtype=jnp.bfloat16))
    np.testing.assert_allclose(np.asarray(out_bf16), ref, atol=1e-2, rtol=1e-2)

    # f32 MXU operands: strict check of the roll/mask structure itself.
    out_f32 = jax.block_until_ready(
        cnn_autoencoder_forward(x, params, compute_dtype=jnp.float32))
    np.testing.assert_allclose(np.asarray(out_f32), ref, atol=2e-3, rtol=2e-3)

    print("KERNEL_OK")
</pallas_src>

<mosaic_0001>
module attributes {stable_mosaic.version = 11 : i64} {
  func.func @_autoenc_kernel(%arg0: i32, %arg1: memref<2x256xf32, #tpu.memory_space<vmem>>, %arg2: memref<16x6xbf16, #tpu.memory_space<vmem>>, %arg3: memref<16x1xf32, #tpu.memory_space<vmem>>, %arg4: memref<8x48xbf16, #tpu.memory_space<vmem>>, %arg5: memref<8x1xf32, #tpu.memory_space<vmem>>, %arg6: memref<2x16x8xbf16, #tpu.memory_space<vmem>>, %arg7: memref<16x1xf32, #tpu.memory_space<vmem>>, %arg8: memref<2x2x16xbf16, #tpu.memory_space<vmem>>, %arg9: memref<2x1xf32, #tpu.memory_space<vmem>>, %arg10: memref<5x256xf32, #tpu.memory_space<vmem>>, %arg11: memref<2x256xf32, #tpu.memory_space<vmem>>) attributes {dimension_semantics = [#tpu.dimension_semantics<parallel>], iteration_bounds = array<i64: 2>, scalar_prefetch = 0 : i64, scratch_operands = 0 : i64, tpu.core_type = #tpu.core_type<tc>, window_params = [{transform_indices = @transform_0, window_bounds = array<i64: 2, 256>}, {pipeline_mode = #tpu.pipeline_mode<synchronous>, transform_indices = @transform_1, window_bounds = array<i64: 16, 6>}, {pipeline_mode = #tpu.pipeline_mode<synchronous>, transform_indices = @transform_2, window_bounds = array<i64: 16, 1>}, {pipeline_mode = #tpu.pipeline_mode<synchronous>, transform_indices = @transform_3, window_bounds = array<i64: 8, 48>}, {pipeline_mode = #tpu.pipeline_mode<synchronous>, transform_indices = @transform_4, window_bounds = array<i64: 8, 1>}, {pipeline_mode = #tpu.pipeline_mode<synchronous>, transform_indices = @transform_5, window_bounds = array<i64: 2, 16, 8>}, {pipeline_mode = #tpu.pipeline_mode<synchronous>, transform_indices = @transform_6, window_bounds = array<i64: 16, 1>}, {pipeline_mode = #tpu.pipeline_mode<synchronous>, transform_indices = @transform_7, window_bounds = array<i64: 2, 2, 16>}, {pipeline_mode = #tpu.pipeline_mode<synchronous>, transform_indices = @transform_8, window_bounds = array<i64: 2, 1>}, {pipeline_mode = #tpu.pipeline_mode<synchronous>, transform_indices = @transform_9, window_bounds = array<i64: 5, 256>}, {transform_indices = @transform_10, window_bounds = array<i64: 2, 256>}]} {
    %c0 = arith.constant 0 : index
    %c0_0 = arith.constant 0 : index
    %0 = vector.load %arg10[%c0, %c0_0] : memref<5x256xf32, #tpu.memory_space<vmem>>, vector<1x256xf32>
    %c1 = arith.constant 1 : index
    %c0_1 = arith.constant 0 : index
    %1 = vector.load %arg10[%c1, %c0_1] : memref<5x256xf32, #tpu.memory_space<vmem>>, vector<1x256xf32>
    %c2 = arith.constant 2 : index
    %c0_2 = arith.constant 0 : index
    %2 = vector.load %arg10[%c2, %c0_2] : memref<5x256xf32, #tpu.memory_space<vmem>>, vector<1x256xf32>
    %c3 = arith.constant 3 : index
    %c0_3 = arith.constant 0 : index
    %3 = vector.load %arg10[%c3, %c0_3] : memref<5x256xf32, #tpu.memory_space<vmem>>, vector<1x256xf32>
    %c4 = arith.constant 4 : index
    %c0_4 = arith.constant 0 : index
    %4 = vector.load %arg10[%c4, %c0_4] : memref<5x256xf32, #tpu.memory_space<vmem>>, vector<1x256xf32>
    %c0_5 = arith.constant 0 : index
    %c0_6 = arith.constant 0 : index
    %5 = vector.load %arg1[%c0_5, %c0_6] : memref<2x256xf32, #tpu.memory_space<vmem>>, vector<2x256xf32>
    %c1_i32 = arith.constant 1 : i32
    %6 = tpu.dynamic_rotate %5 by %c1_i32 dim 1 : vector<2x256xf32>, i32 -> vector<2x256xf32>
    %7 = vector.broadcast %0 : vector<1x256xf32> to vector<2x256xf32>
    %8 = arith.mulf %6, %7 : vector<2x256xf32>
    %c255_i32 = arith.constant 255 : i32
    %9 = tpu.dynamic_rotate %5 by %c255_i32 dim 1 : vector<2x256xf32>, i32 -> vector<2x256xf32>
    %10 = vector.broadcast %1 : vector<1x256xf32> to vector<2x256xf32>
    %11 = arith.mulf %9, %10 : vector<2x256xf32>
    %12 = tpu.concatenate %8, %5, %11 in 0 : vector<2x256xf32>, vector<2x256xf32>, vector<2x256xf32> -> vector<6x256xf32>
    %c0_7 = arith.constant 0 : index
    %c0_8 = arith.constant 0 : index
    %13 = vector.load %arg2[%c0_7, %c0_8] : memref<16x6xbf16, #tpu.memory_space<vmem>>, vector<16x6xbf16>
    %14 = arith.truncf %12 : vector<6x256xf32> to vector<6x256xbf16>
    %cst = arith.constant dense<0.000000e+00> : vector<16x256xf32>
    %15 = tpu.matmul %13, %14, %cst {dimension_numbers = #tpu.dot_dimension_numbers<[1], [0], [0], [1], [0, 0, 1, 1], [], []>} : vector<16x6xbf16>, vector<6x256xbf16>, vector<16x256xf32> -> vector<16x256xf32>
    %c0_9 = arith.constant 0 : index
    %c0_10 = arith.constant 0 : index
    %16 = vector.load %arg3[%c0_9, %c0_10] : memref<16x1xf32, #tpu.memory_space<vmem>>, vector<16x1xf32>
    %17 = vector.broadcast %16 : vector<16x1xf32> to vector<16x256xf32>
    %18 = arith.addf %15, %17 : vector<16x256xf32>
    %cst_11 = arith.constant 0.000000e+00 : f32
    %19 = vector.broadcast %cst_11 : f32 to vector<16x256xf32>
    %20 = arith.maximumf %18, %19 : vector<16x256xf32>
    %c255_i32_12 = arith.constant 255 : i32
    %21 = tpu.dynamic_rotate %20 by %c255_i32_12 dim 1 : vector<16x256xf32>, i32 -> vector<16x256xf32>
    %22 = arith.maximumf %20, %21 : vector<16x256xf32>
    %c2_i32 = arith.constant 2 : i32
    %23 = tpu.dynamic_rotate %22 by %c2_i32 dim 1 : vector<16x256xf32>, i32 -> vector<16x256xf32>
    %24 = vector.broadcast %0 : vector<1x256xf32> to vector<16x256xf32>
    %25 = arith.mulf %23, %24 : vector<16x256xf32>
    %c254_i32 = arith.constant 254 : i32
    %26 = tpu.dynamic_rotate %22 by %c254_i32 dim 1 : vector<16x256xf32>, i32 -> vector<16x256xf32>
    %27 = vector.broadcast %2 : vector<1x256xf32> to vector<16x256xf32>
    %28 = arith.mulf %26, %27 : vector<16x256xf32>
    %29 = tpu.concatenate %25, %22, %28 in 0 : vector<16x256xf32>, vector<16x256xf32>, vector<16x256xf32> -> vector<48x256xf32>
    %c0_13 = arith.constant 0 : index
    %c0_14 = arith.constant 0 : index
    %30 = vector.load %arg4[%c0_13, %c0_14] : memref<8x48xbf16, #tpu.memory_space<vmem>>, vector<8x48xbf16>
    %31 = arith.truncf %29 : vector<48x256xf32> to vector<48x256xbf16>
    %cst_15 = arith.constant dense<0.000000e+00> : vector<8x256xf32>
    %32 = tpu.matmul %30, %31, %cst_15 {dimension_numbers = #tpu.dot_dimension_numbers<[1], [0], [0], [1], [0, 0, 1, 1], [], []>} : vector<8x48xbf16>, vector<48x256xbf16>, vector<8x256xf32> -> vector<8x256xf32>
    %c0_16 = arith.constant 0 : index
    %c0_17 = arith.constant 0 : index
    %33 = vector.load %arg5[%c0_16, %c0_17] : memref<8x1xf32, #tpu.memory_space<vmem>>, vector<8x1xf32>
    %34 = vector.broadcast %33 : vector<8x1xf32> to vector<8x256xf32>
    %35 = arith.addf %32, %34 : vector<8x256xf32>
    %cst_18 = arith.constant 0.000000e+00 : f32
    %36 = vector.broadcast %cst_18 : f32 to vector<8x256xf32>
    %37 = arith.maximumf %35, %36 : vector<8x256xf32>
    %c254_i32_19 = arith.constant 254 : i32
    %38 = tpu.dynamic_rotate %37 by %c254_i32_19 dim 1 : vector<8x256xf32>, i32 -> vector<8x256xf32>
    %39 = arith.maximumf %37, %38 : vector<8x256xf32>
    %40 = vector.broadcast %3 : vector<1x256xf32> to vector<8x256xf32>
    %41 = arith.mulf %39, %40 : vector<8x256xf32>
    %c0_20 = arith.constant 0 : index
    %c0_21 = arith.constant 0 : index
    %c0_22 = arith.constant 0 : index
    %42 = vector.load %arg6[%c0_20, %c0_21, %c0_22] : memref<2x16x8xbf16, #tpu.memory_space<vmem>>, vector<1x16x8xbf16>
    %43 = vector.shape_cast %42 : vector<1x16x8xbf16> to vector<16x8xbf16>
    %44 = arith.truncf %41 : vector<8x256xf32> to vector<8x256xbf16>
    %cst_23 = arith.constant dense<0.000000e+00> : vector<16x256xf32>
    %45 = tpu.matmul %43, %44, %cst_23 {dimension_numbers = #tpu.dot_dimension_numbers<[1], [0], [0], [1], [0, 0, 1, 1], [], []>} : vector<16x8xbf16>, vector<8x256xbf16>, vector<16x256xf32> -> vector<16x256xf32>
    %c1_24 = arith.constant 1 : index
    %c0_25 = arith.constant 0 : index
    %c0_26 = arith.constant 0 : index
    %46 = vector.load %arg6[%c1_24, %c0_25, %c0_26] : memref<2x16x8xbf16, #tpu.memory_space<vmem>>, vector<1x16x8xbf16>
    %47 = vector.shape_cast %46 : vector<1x16x8xbf16> to vector<16x8xbf16>
    %48 = arith.truncf %41 : vector<8x256xf32> to vector<8x256xbf16>
    %cst_27 = arith.constant dense<0.000000e+00> : vector<16x256xf32>
    %49 = tpu.matmul %47, %48, %cst_27 {dimension_numbers = #tpu.dot_dimension_numbers<[1], [0], [0], [1], [0, 0, 1, 1], [], []>} : vector<16x8xbf16>, vector<8x256xbf16>, vector<16x256xf32> -> vector<16x256xf32>
    %c2_i32_28 = arith.constant 2 : i32
    %50 = tpu.dynamic_rotate %49 by %c2_i32_28 dim 1 : vector<16x256xf32>, i32 -> vector<16x256xf32>
    %51 = arith.addf %45, %50 : vector<16x256xf32>
    %c0_29 = arith.constant 0 : index
    %c0_30 = arith.constant 0 : index
    %52 = vector.load %arg7[%c0_29, %c0_30] : memref<16x1xf32, #tpu.memory_space<vmem>>, vector<16x1xf32>
    %53 = vector.broadcast %52 : vector<16x1xf32> to vector<16x256xf32>
    %54 = arith.addf %51, %53 : vector<16x256xf32>
    %cst_31 = arith.constant 0.000000e+00 : f32
    %55 = vector.broadcast %cst_31 : f32 to vector<16x256xf32>
    %56 = arith.maximumf %54, %55 : vector<16x256xf32>
    %57 = vector.broadcast %4 : vector<1x256xf32> to vector<16x256xf32>
    %58 = arith.mulf %56, %57 : vector<16x256xf32>
    %c0_32 = arith.constant 0 : index
    %c0_33 = arith.constant 0 : index
    %c0_34 = arith.constant 0 : index
    %59 = vector.load %arg8[%c0_32, %c0_33, %c0_34] : memref<2x2x16xbf16, #tpu.memory_space<vmem>>, vector<1x2x16xbf16>
    %60 = vector.shape_cast %59 : vector<1x2x16xbf16> to vector<2x16xbf16>
    %61 = arith.truncf %58 : vector<16x256xf32> to vector<16x256xbf16>
    %cst_35 = arith.constant dense<0.000000e+00> : vector<2x256xf32>
    %62 = tpu.matmul %60, %61, %cst_35 {dimension_numbers = #tpu.dot_dimension_numbers<[1], [0], [0], [1], [0, 0, 1, 1], [], []>} : vector<2x16xbf16>, vector<16x256xbf16>, vector<2x256xf32> -> vector<2x256xf32>
    %c1_36 = arith.constant 1 : index
    %c0_37 = arith.constant 0 : index
    %c0_38 = arith.constant 0 : index
    %63 = vector.load %arg8[%c1_36, %c0_37, %c0_38] : memref<2x2x16xbf16, #tpu.memory_space<vmem>>, vector<1x2x16xbf16>
    %64 = vector.shape_cast %63 : vector<1x2x16xbf16> to vector<2x16xbf16>
    %65 = arith.truncf %58 : vector<16x256xf32> to vector<16x256xbf16>
    %cst_39 = arith.constant dense<0.000000e+00> : vector<2x256xf32>
    %66 = tpu.matmul %64, %65, %cst_39 {dimension_numbers = #tpu.dot_dimension_numbers<[1], [0], [0], [1], [0, 0, 1, 1], [], []>} : vector<2x16xbf16>, vector<16x256xbf16>, vector<2x256xf32> -> vector<2x256xf32>
    %c1_i32_40 = arith.constant 1 : i32
    %67 = tpu.dynamic_rotate %66 by %c1_i32_40 dim 1 : vector<2x256xf32>, i32 -> vector<2x256xf32>
    %68 = arith.addf %62, %67 : vector<2x256xf32>
    %c0_41 = arith.constant 0 : index
    %c0_42 = arith.constant 0 : index
    %69 = vector.load %arg9[%c0_41, %c0_42] : memref<2x1xf32, #tpu.memory_space<vmem>>, vector<2x1xf32>
    %70 = vector.broadcast %69 : vector<2x1xf32> to vector<2x256xf32>
    %71 = arith.addf %68, %70 : vector<2x256xf32>
    %72 = math.absf %71 : vector<2x256xf32>
    %cst_43 = arith.constant 0.000000e+00 : f32
    %73 = vector.broadcast %cst_43 : f32 to vector<2x256xf32>
    %74 = arith.subf %73, %72 : vector<2x256xf32>
    %75 = math.exp %74 : vector<2x256xf32>
    %cst_44 = arith.constant 0.000000e+00 : f32
    %76 = vector.broadcast %cst_44 : f32 to vector<2x256xf32>
    %77 = arith.cmpf oge, %71, %76 : vector<2x256xf32>
    %cst_45 = arith.constant 1.000000e+00 : f32
    %78 = vector.broadcast %cst_45 : f32 to vector<2x256xf32>
    %79 = arith.select %77, %78, %75 : vector<2x256xi1>, vector<2x256xf32>
    %cst_46 = arith.constant 1.000000e+00 : f32
    %80 = vector.broadcast %cst_46 : f32 to vector<2x256xf32>
    %81 = arith.addf %80, %75 : vector<2x256xf32>
    %82 = tpu.reciprocal %81 {approx = true} : vector<2x256xf32> -> vector<2x256xf32>
    %83 = arith.mulf %79, %82 : vector<2x256xf32>
    %c0_47 = arith.constant 0 : index
    %c0_48 = arith.constant 0 : index
    %84 = vector.load %arg11[%c0_47, %c0_48] : memref<2x256xf32, #tpu.memory_space<vmem>>, vector<2x256xf32>
    tpu.vector_store %arg11[%c0_47, %c0_48], %83 {strides = array<i32>} : memref<2x256xf32, #tpu.memory_space<vmem>>, vector<2x256xf32>,
    return
  }
  func.func @transform_0(%arg0: i32) -> (i32, i32) {
    %c0_i32 = arith.constant 0 : i32
    %c0_i32_0 = arith.constant 0 : i32
    return %c0_i32, %arg0 : i32, i32
  }
  func.func @transform_1(%arg0: i32) -> (i32, i32) {
    %c0_i32 = arith.constant 0 : i32
    %c0_i32_0 = arith.constant 0 : i32
    %c0_i32_1 = arith.constant 0 : i32
    return %c0_i32, %c0_i32_0 : i32, i32
  }
  func.func @transform_2(%arg0: i32) -> (i32, i32) {
    %c0_i32 = arith.constant 0 : i32
    %c0_i32_0 = arith.constant 0 : i32
    %c0_i32_1 = arith.constant 0 : i32
    return %c0_i32, %c0_i32_0 : i32, i32
  }
  func.func @transform_3(%arg0: i32) -> (i32, i32) {
    %c0_i32 = arith.constant 0 : i32
    %c0_i32_0 = arith.constant 0 : i32
    %c0_i32_1 = arith.constant 0 : i32
    return %c0_i32, %c0_i32_0 : i32, i32
  }
  func.func @transform_4(%arg0: i32) -> (i32, i32) {
    %c0_i32 = arith.constant 0 : i32
    %c0_i32_0 = arith.constant 0 : i32
    %c0_i32_1 = arith.constant 0 : i32
    return %c0_i32, %c0_i32_0 : i32, i32
  }
  func.func @transform_5(%arg0: i32) -> (i32, i32, i32) {
    %c0_i32 = arith.constant 0 : i32
    %c0_i32_0 = arith.constant 0 : i32
    %c0_i32_1 = arith.constant 0 : i32
    %c0_i32_2 = arith.constant 0 : i32
    return %c0_i32, %c0_i32_0, %c0_i32_1 : i32, i32, i32
  }
  func.func @transform_6(%arg0: i32) -> (i32, i32) {
    %c0_i32 = arith.constant 0 : i32
    %c0_i32_0 = arith.constant 0 : i32
    %c0_i32_1 = arith.constant 0 : i32
    return %c0_i32, %c0_i32_0 : i32, i32
  }
  func.func @transform_7(%arg0: i32) -> (i32, i32, i32) {
    %c0_i32 = arith.constant 0 : i32
    %c0_i32_0 = arith.constant 0 : i32
    %c0_i32_1 = arith.constant 0 : i32
    %c0_i32_2 = arith.constant 0 : i32
    return %c0_i32, %c0_i32_0, %c0_i32_1 : i32, i32, i32
  }
  func.func @transform_8(%arg0: i32) -> (i32, i32) {
    %c0_i32 = arith.constant 0 : i32
    %c0_i32_0 = arith.constant 0 : i32
    %c0_i32_1 = arith.constant 0 : i32
    return %c0_i32, %c0_i32_0 : i32, i32
  }
  func.func @transform_9(%arg0: i32) -> (i32, i32) {
    %c0_i32 = arith.constant 0 : i32
    %c0_i32_0 = arith.constant 0 : i32
    %c0_i32_1 = arith.constant 0 : i32
    return %c0_i32, %c0_i32_0 : i32, i32
  }
  func.func @transform_10(%arg0: i32) -> (i32, i32) {
    %c0_i32 = arith.constant 0 : i32
    %c0_i32_0 = arith.constant 0 : i32
    return %c0_i32, %arg0 : i32, i32
  }
}

</mosaic_0001>

<bundles_post_ra>
// kernel: tpu_custom_call.1
= control target key start
LH: loop header
LB: loop body
LE: loop exit
PB: predicated region body
PF: predicated region fallthrough
CT: control target
= control target key end

     0   :  { %15 = vsyncpa [#allocation3], 0  ;;  %s1370_s0 = inlined_call_operand.vmem [shape: f32[2,512], index: 0, kind: input, shape index: {}]   ;;  %s1371_s1 = inlined_call_operand.vmem [shape: bf16[16,6], index: 1, kind: input, shape index: {}]   ;;  %s1372_s2 = inlined_call_operand.vmem [shape: f32[16,1], index: 2, kind: input, shape index: {}]   ;;  %s1373_s3 = inlined_call_operand.vmem [shape: bf16[8,48], index: 3, kind: input, shape index: {}]   ;;  %s1374_s4 = inlined_call_operand.vmem [shape: f32[8,1], index: 4, kind: input, shape index: {}]   ;;  %s1375_s5 = inlined_call_operand.vmem [shape: bf16[2,16,8], index: 5, kind: input, shape index: {}]   ;;  %s1376_s6 = inlined_call_operand.vmem [shape: f32[16,1], index: 6, kind: input, shape index: {}]   ;;  %s1377_s7 = inlined_call_operand.vmem [shape: bf16[2,2,16], index: 7, kind: input, shape index: {}]   ;;  %s1378_s8 = inlined_call_operand.vmem [shape: f32[2,1], index: 8, kind: input, shape index: {}]   ;;  %s1379_s9 = inlined_call_operand.vmem [shape: f32[5,256], index: 9, kind: input, shape index: {}]   ;;  %s1380_s10 = inlined_call_operand.hbm [shape: f32[2,512], index: 10, kind: output, shape index: {}]  }
   0x1   :  { %17 = vsyncpa [#allocation3 + $0x1], 0  ;;  %s1140_s13 = smov 0   ;;  %s1142_s14 = smov 0  }
   0x2   :  { %s1144_s15 = smov 0   ;;  %s1146_s16 = smov 0  }
   0x3 LB: > { %s1161_s17 = sadd.s32 4294967295, %s1078_s16   ;;  %s915_s18 = sadd.s32 4294967294, %s1078_s16   ;;  %s1078_s16 = sphi %s1146_s16, %s1386_s16   ;;  %s1074_s15 = sphi %s1144_s15, %s1385_s15   ;;  %s1070_s14 = sphi %s1142_s14, %s1384_s14   ;;  %s1066_s13 = sphi %s1140_s13, %s1383_s13  }
   0x4   : > { %s1165_s19 = sadd.s32 1, %s1078_s16   ;;  %s245_s20 = sadd.s32 1, %s1074_s15 }
   0x5   : > { %s242_s21 = ssub.s32 %s1078_s16, %s1165_s19  ;;  %p255_p0 = scmp.ne.s32.totalorder %s1074_s15, %s1070_s14 }
   0x6   : > { %p243_p1 = scmp.eq.s32.totalorder %s242_s21, 0  ;;  %p256_p2 = scmp.eq.s32.totalorder %s1161_s17, 1 }
   0x7   : > { %p261_p3 = scmp.ne.s32.totalorder %s1070_s14, %s1066_s13  ;;  %p262_p4 = scmp.eq.s32.totalorder %s915_s18, 1 }
   0x8   : > { %s1176_s22 = scalar_select %p243_p1, %s1074_s15, %s245_s20  }
   0x9   : > { %p1178_p5 = por %p256_p2, %p255_p0  ;;  %p1182_p6 = por %p262_p4, %p261_p3 }
   0xa   : > { %p918_p7 = scmp.ge.s32.totalorder %s1078_s16, 1  ;;  %p316_p8 = scmp.lt.s32.totalorder %s1078_s16, 3 }
   0xc   : > { %p317_p9 = pnand %p918_p7, %p316_p8 }
   0xd   : > { %s920_s25 = sshll.u32 (!%p317_p9), %s1161_s17, 1  ;;  %s1080_s30 = smov (!%p317_p9), 1  }
   0xe   : > { %320 = sbr.rel (%p317_p9) target bundleno = 1364 (0x554), region = 60  ;;  %p355_p10 = scmp.lt.s32.totalorder (!%p317_p9), %s920_s25, 3 }
   0xf   : > { %s1081_s11 = smov (!%p317_p9), 127   ;;  %s1083_s18 = smov (!%p317_p9), 126  }
  0x10   : > { %s1084_s20 = smov (!%p317_p9), 2   ;;  %s1036_s12 = scalar_lea.hbm (!%p317_p9), %s1380_s10, 8 }
  0x13   : > { %s1388_s25 = smov (!%p355_p10, %s920_s25), 3  ;;  %v435_v5 = vld [vmem:[%s1372_s2] sm:$0xff]  ;;  %v1082_v6 = vmov 0   ;;  %v382_v8 = vlaneseq  ;;  %v436_v9 = vld [vmem:[%s1372_s2 + $0x8] sm:$0xff]  ;;  %vm425_vm2 = vcmask 1041408   ;;  %vm428_vm3 = vcmask 1043456  }
  0x14   : > { %s921_s26 = sshll.u32 %s1388_s25, 1  ;;  %1006 = vset.pattern.permute.xlu2 %v1082_v6  ;;  %1007 = vset.pattern.permute.xlu0 %v1082_v6  ;;  %v362_v12 = vld [vmem:[%s1379_s9] ss:$8 sm:$0x3]  ;;  %vm456_vm4 = vcmask 1042432   ;;  %vm452_vm5 = vcmask 48128  }
  0x15   : > { %s358_s29 = scalar_lea.vmem %s1370_s0, %s921_s26  ;;  %439 = vperm.xlu2 %1006, %v435_v5   ;;  %v1202_v10 = vand.u32 127, %v382_v8  ;;  %v922_v14 = vld [vmem:[%s1379_s9 + $0x1] ss:$8 sm:$0x3]  ;;  %v1211_v15 = vperm.slane %v362_v12, 0  ;;  %v1213_v16 = vperm.slane %v362_v12, 1 }
  0x16   : > { %v371_v0 = vld [vmem:[%s358_s29] sm:$0xf]  ;;  %v407_v19 = vperm.slane %v922_v14, 0  ;;  %v408_v20 = vperm.slane %v922_v14, 1  ;;  %vm563_vm8 = vcmask 392192   ;;  %vm622_vm9 = vcmask 64512  }
  0x17   : > { %373 = vst [vmem:[#allocation1] ss:$4 sm:$0xff] %v371_v0  ;;  %vm384_vm0 = vcmp.lt.s32.totalorder %v1202_v10, 1  ;;  %vm403_vm1 = vcmp.lt.s32.totalorder %v1202_v10, 127  ;;  %v958_v40 = vld [vmem:[%s1371_s1] sm:$0xff]  ;;  %vm536_vm6 = vcmp.lt.s32.totalorder %v1202_v10, 126 }
  0x18   : > { %v557_v6 = vld [vmem:[%s1374_s4] sm:$0xff]  ;;  %vm519_vm7 = vcmp.lt.s32.totalorder %v1202_v10, 2  ;;  %vm742_vm10 = vcmask 130048   ;;  %s961_s29 = sshll.u32 %s1161_s17, 2 }
  0x1d   : > { %444 = vperm.xlu2 %1006, %v436_v9  }
  0x1e   : > { %v374_v1 = vld.sshfl [vmem:[#allocation1] sm:$0xff pattern:$0x73625140]  ;;  %v375_v2 = vld.sshfl [vmem:[#allocation1 + $0x8] sm:$0xff pattern:$0x73625140] }
  0x1f   : > { %378 = vrot.lane.b32.xlu1 %v374_v1, %s1080_s30  ;;  %394 = vst [vmem:[#allocation1] ss:$4 sm:$0xff] %v371_v0 }
  0x26   : > { %v395_v3 = vld.sshfl [vmem:[#allocation1] sm:$0xff pattern:$0x73625140]  ;;  %v396_v4 = vld.sshfl [vmem:[#allocation1 + $0x8] sm:$0xff pattern:$0x73625140] }
  0x27   : > { %399 = vrot.lane.b32.xlu0 %v395_v3, %s1081_s11  ;;  %380 = vrot.lane.b32.xlu1 %v375_v2, %s1080_s30  ;;  %414 = vst [vmem:[#allocation1 + $0x1] ss:$4 sm:$0xff] %v371_v0 }
  0x2e   : > { %v415_v26 = vld.sshfl [vmem:[#allocation1] sm:$0xff pattern:$0x73625140]  ;;  %v416_v29 = vld.sshfl [vmem:[#allocation1 + $0x8] sm:$0xff pattern:$0x73625140] }
  0x2f   : > { %401 = vrot.lane.b32.xlu0 %v396_v4, %s1081_s11 }
  0x6f   : > { %v440_v41 = vpop.permute.xlu2 %439 }
  0x77   : > { %v445_v48 = vpop.permute.xlu2 %444 }
  0x91   : > { %v379_v7 = vpop.permute.xlu1 %378 }
  0x99   : > { %v400_v11 = vpop.permute.xlu0 %399  ;;  %v381_v13 = vpop.permute.xlu1 %380 }
  0x9a   : > { %v385_v17 = vsel %vm384_vm0, %v379_v7, %v381_v13  ;;  %v386_v18 = vsel %vm384_vm0, %v381_v13, %v379_v7 }
  0x9b   : > { %v392_v22 = vmul.f32 %v1211_v15, %v386_v18  ;;  %v393_v23 = vmul.f32 %v1213_v16, %v385_v17 }
  0x9d   : > { %v426_v32 = vsel %vm425_vm2, %v392_v22, %v415_v26  ;;  %v427_v33 = vsel %vm425_vm2, %v393_v23, %v416_v29 }
  0xa1   : > { %v402_v21 = vpop.permute.xlu0 %401 }
  0xa2   : > { %v404_v24 = vsel %vm403_vm1, %v400_v11, %v402_v21  ;;  %v405_v25 = vsel %vm403_vm1, %v402_v21, %v400_v11  ;;  %v923_v11 = vld [vmem:[%s1379_s9 + $0x2] ss:$8 sm:$0x3] }
  0xa3   : > { %v411_v27 = vmul.f32 %v407_v19, %v404_v24  ;;  %v412_v28 = vmul.f32 %v408_v20, %v405_v25  ;;  %v542_v12 = vperm.slane %v923_v11, 0  ;;  %v543_v13 = vperm.slane %v923_v11, 1 }
  0xa5   : > { %v421_v30 = vrot.slane %v411_v27, 4  ;;  %v422_v31 = vrot.slane %v412_v28, 4 }
  0xa7   : > { %v429_v34 = vsel %vm428_vm3, %v426_v32, %v421_v30  ;;  %v430_v35 = vsel %vm428_vm3, %v427_v33, %v422_v31 }
  0xa8   : > { %v433_v36 = vpack.c.bf16 %v429_v34, %v429_v34  ;;  %v434_v37 = vpack.c.bf16 %v430_v35, %v430_v35 }
  0xaa   : > { %v458_v38 = vsel %vm456_vm4, %v433_v36, 0  ;;  %v461_v39 = vsel %vm456_vm4, %v434_v37, 0 }
  0xab   : > { %470 = vmatpush.bf16.msra.mxu0 %v458_v38  ;;  %484 = vmatpush.bf16.msra.mxu1 %v461_v39 }
  0xae   : > { %930 = vmatmul.msk.bf16.vlgmr.msra.gmra.mxu0 %vm452_vm5, %v958_v40  ;;  %931 = vmatmul.msk.bf16.vlgmr.msra.gmra.mxu1 %vm452_vm5, %v958_v40  ;;  %v550_v40 = vld [vmem:[%s1373_s3] sm:$0xf] }
 0x12b   : > { %v472_v42 = vpop.f32.mrf.mxu0  ;;  %v486_v43 = vpop.f32.mrf.mxu1 }
 0x12c   : > { %v473_v44 = vadd.f32 %v472_v42, %v440_v41  ;;  %v487_v45 = vadd.f32 %v486_v43, %v440_v41 }
 0x12e   : > { %v491_v46 = vmax.f32 %v473_v44, 0.0  ;;  %v492_v47 = vmax.f32 %v487_v45, 0.0 }
 0x130   : > { %499 = vrot.lane.b32.xlu2 %v492_v47, %s1081_s11  ;;  %495 = vrot.lane.b32.xlu0 %v491_v46, %s1081_s11 }
 0x133   : > { %v474_v49 = vpop.f32.mrf.mxu0  ;;  %v488_v50 = vpop.f32.mrf.mxu1 }
 0x134   : > { %v475_v51 = vadd.f32 %v474_v49, %v445_v48  ;;  %v489_v52 = vadd.f32 %v488_v50, %v445_v48  ;;  %v924_v48 = vld [vmem:[%s1379_s9 + $0x3] ss:$8 sm:$0x3] }
 0x136   : > { %v493_v53 = vmax.f32 %v475_v51, 0.0  ;;  %v494_v54 = vmax.f32 %v489_v52, 0.0  ;;  %v604_v51 = vperm.slane %v924_v48, 0  ;;  %v605_v52 = vperm.slane %v924_v48, 1 }
 0x138   : > { %497 = vrot.lane.b32.xlu1 %v493_v53, %s1081_s11  ;;  %501 = vrot.lane.b32.xlu0 %v494_v54, %s1081_s11 }
 0x18a   : > { %v500_v55 = vpop.permute.xlu2 %499 }
 0x1a2   : > { %v496_v56 = vpop.permute.xlu0 %495 }
 0x1a3   : > { %v503_v57 = vsel %vm403_vm1, %v496_v56, %v500_v55  ;;  %v505_v58 = vsel %vm403_vm1, %v500_v55, %v496_v56 }
 0x1a4   : > { %v507_v59 = vmax.f32 %v491_v46, %v503_v57  ;;  %v508_v60 = vmax.f32 %v492_v47, %v505_v58 }
 0x1a6   : > { %532 = vrot.lane.b32.xlu0 %v508_v60, %s1083_s18  ;;  %511 = vrot.lane.b32.xlu2 %v507_v59, %s1084_s20 }
 0x1a7   : > { %528 = vrot.lane.b32.xlu1 %v507_v59, %s1083_s18 }
 0x1aa   : > { %v498_v61 = vpop.permute.xlu1 %497  ;;  %v502_v62 = vpop.permute.xlu0 %501 }
 0x1ab   : > { %v504_v63 = vsel %vm403_vm1, %v498_v61, %v502_v62  ;;  %v506_v0 = vsel %vm403_vm1, %v502_v62, %v498_v61 }
 0x1ac   : > { %v509_v1 = vmax.f32 %v493_v53, %v504_v63  ;;  %v510_v2 = vmax.f32 %v494_v54, %v506_v0  ;;  %v960_v63 = vld [vmem:[%s1375_s5 + $0x8] sm:$0xff]  ;;  %v959_v0 = vld [vmem:[%s1375_s5] sm:$0xff] }
 0x1ae   : > { %513 = vrot.lane.b32.xlu0 %v509_v1, %s1084_s20  ;;  %530 = vrot.lane.b32.xlu2 %v509_v1, %s1083_s18  ;;  %v553_v3 = vpack.c.bf16 %v509_v1, %v507_v59  ;;  %v554_v4 = vpack.c.bf16 %v510_v2, %v508_v60 }
 0x1af   : > { %534 = vrot.lane.b32.xlu1 %v510_v2, %s1083_s18 }
 0x1b6   : > { %517 = vrot.lane.b32.xlu2 %v510_v2, %s1084_s20  ;;  %560 = vperm.xlu0 %1007, %v557_v6   ;;  %v807_v6 = vld [vmem:[%s1378_s8] sm:$0x3] }
 0x1b7   : > { %515 = vrot.lane.b32.xlu1 %v508_v60, %s1084_s20 }
 0x200   : > { %v512_v5 = vpop.permute.xlu2 %511 }
 0x208   : > { %v531_v9 = vpop.permute.xlu2 %530 }
 0x210   : > { %v518_v28 = vpop.permute.xlu2 %517 }
 0x218   : > { %v533_v8 = vpop.permute.xlu0 %532 }
 0x219   : > { %v529_v7 = vpop.permute.xlu1 %528 }
 0x21a   : > { %v537_v14 = vsel %vm536_vm6, %v529_v7, %v533_v8  ;;  %v539_v17 = vsel %vm536_vm6, %v533_v8, %v529_v7  ;;  %v708_v7 = vld [vmem:[%s1376_s6] sm:$0xff] }
 0x21b   : > { %v546_v21 = vmul.f32 %v542_v12, %v537_v14  ;;  %v547_v23 = vmul.f32 %v543_v13, %v539_v17 }
 0x220   : > { %v514_v25 = vpop.permute.xlu0 %513 }
 0x221   : > { %v535_v18 = vpop.permute.xlu1 %534  ;;  %v523_v29 = vsel %vm519_vm7, %v518_v28, %v514_v25  ;;  %v521_v30 = vsel %vm519_vm7, %v514_v25, %v518_v28 }
 0x222   : > { %v538_v19 = vsel %vm536_vm6, %v531_v9, %v535_v18  ;;  %v540_v20 = vsel %vm536_vm6, %v535_v18, %v531_v9  ;;  %v526_v32 = vmul.f32 %v523_v29, %v1211_v15  ;;  %v527_v35 = vmul.f32 %v521_v30, %v1213_v16 }
 0x223   : > { %v548_v22 = vmul.f32 %v542_v12, %v538_v19  ;;  %v549_v24 = vmul.f32 %v543_v13, %v540_v20 }
 0x225   : > { %v555_v26 = vpack.c.bf16 %v548_v22, %v546_v21  ;;  %v556_v27 = vpack.c.bf16 %v549_v24, %v547_v23  ;;  %v925_v22 = vld [vmem:[%s1379_s9 + $0x4] ss:$8 sm:$0x3] }
 0x227   : > { %572 = vmatpush.bf16.msra.mxu2 %v555_v26  ;;  %585 = vmatpush.bf16.msra.mxu3 %v556_v27 }
 0x228   : > { %v561_v41 = vpop.permute.xlu0 %560 }
 0x229   : > { %v516_v31 = vpop.permute.xlu1 %515 }
 0x22a   : > { %v520_v33 = vsel %vm519_vm7, %v512_v5, %v516_v31  ;;  %v522_v34 = vsel %vm519_vm7, %v516_v31, %v512_v5  ;;  %v729_v31 = vperm.slane %v925_v22, 0 }
 0x22b   : > { %v524_v36 = vmul.f32 %v522_v34, %v1211_v15  ;;  %v525_v37 = vmul.f32 %v520_v33, %v1213_v16  ;;  %573 = vmatpush.bf16.msra.mxu2 %v553_v3  ;;  %586 = vmatpush.bf16.msra.mxu3 %v554_v4  ;;  %v709_v3 = vld [vmem:[%s1376_s6 + $0x8] sm:$0xff] }
 0x22d   : > { %v551_v38 = vpack.c.bf16 %v526_v32, %v524_v36  ;;  %v552_v39 = vpack.c.bf16 %v527_v35, %v525_v37  ;;  %v730_v32 = vperm.slane %v925_v22, 1 }
 0x22f   : > { %574 = vmatpush.bf16.msra.mxu2 %v551_v38  ;;  %587 = vmatpush.bf16.msra.mxu3 %v552_v39 }
 0x232   : > { %932 = vmatmul.msk.bf16.vlgmr.msra.gmra.mxu2 %vm563_vm8, %v550_v40  ;;  %933 = vmatmul.msk.bf16.vlgmr.msra.gmra.mxu3 %vm563_vm8, %v550_v40 }
 0x2b5   : > { %v576_v42 = vpop.f32.mrf.mxu2  ;;  %v589_v43 = vpop.f32.mrf.mxu3 }
 0x2b6   : > { %v577_v44 = vadd.f32 %v576_v42, %v561_v41  ;;  %v590_v15 = vadd.f32 %v589_v43, %v561_v41 }
 0x2b8   : > { %v593_v45 = vmax.f32 %v577_v44, 0.0  ;;  %v594_v16 = vmax.f32 %v590_v15, 0.0 }
 0x2ba   : > { %597 = vrot.lane.b32.xlu2 %v594_v16, %s1083_s18  ;;  %595 = vrot.lane.b32.xlu1 %v593_v45, %s1083_s18 }
 0x2bd   : > { %v578_v46 = vpop.f32.mrf.mxu2  ;;  %v591_v47 = vpop.f32.mrf.mxu3 }
 0x314   : > { %v598_v49 = vpop.permute.xlu2 %597 }
 0x32c   : > { %v596_v50 = vpop.permute.xlu1 %595 }
 0x32d   : > { %v599_v53 = vsel %vm536_vm6, %v596_v50, %v598_v49  ;;  %v600_v54 = vsel %vm536_vm6, %v598_v49, %v596_v50 }
 0x32e   : > { %v601_v55 = vmax.f32 %v593_v45, %v599_v53  ;;  %v602_v56 = vmax.f32 %v594_v16, %v600_v54  ;;  %v948_v45 = vld [vmem:[%s1377_s7 + $0x1] sm:$0x1]  ;;  %v737_v16 = vld [vmem:[%s1377_s7] sm:$0x1] }
 0x330   : > { %v608_v57 = vmul.f32 %v604_v51, %v601_v55  ;;  %v609_v58 = vmul.f32 %v605_v52, %v602_v56 }
 0x332   : > { %v612_v59 = vpack.c.bf16 %v608_v57, %v608_v57  ;;  %v613_v60 = vpack.c.bf16 %v609_v58, %v609_v58 }
 0x334   : > { %v627_v61 = vsel %vm428_vm3, %v612_v59, 0  ;;  %v630_v62 = vsel %vm428_vm3, %v613_v60, 0 }
 0x335   : > { %639 = vmatpush.bf16.msrb.mxu0 %v627_v61  ;;  %653 = vmatpush.bf16.msrb.mxu1 %v630_v62 }
 0x336   : > { %687 = vmatpush.bf16.msrb.mxu2 %v627_v61  ;;  %701 = vmatpush.bf16.msrb.mxu3 %v630_v62 }
 0x338   : > { %940 = vmatmul.msk.bf16.vlgmr.msrb.gmra.mxu0 %vm622_vm9, %v960_v63  ;;  %941 = vmatmul.msk.bf16.vlgmr.msrb.gmra.mxu1 %vm622_vm9, %v960_v63 }
 0x339   : > { %946 = vmatmul.msk.bf16.vlgmr.msrb.gmra.mxu2 %vm622_vm9, %v959_v0  ;;  %947 = vmatmul.msk.bf16.vlgmr.msrb.gmra.mxu3 %vm622_vm9, %v959_v0 }
 0x3b5   : > { %v641_v1 = vpop.f32.mrf.mxu0  ;;  %v655_v2 = vpop.f32.mrf.mxu1 }
 0x3b6   : > { %664 = vrot.lane.b32.xlu0 %v655_v2, %s1084_s20  ;;  %660 = vrot.lane.b32.xlu1 %v641_v1, %s1084_s20 }
 0x3bc   : > { %v703_v9 = vpop.f32.mrf.mxu3  ;;  %v689_v11 = vpop.f32.mrf.mxu2 }
 0x3bd   : > { %v643_v4 = vpop.f32.mrf.mxu0  ;;  %v657_v5 = vpop.f32.mrf.mxu1 }
 0x3be   : > { %717 = vperm.xlu0 %1007, %v709_v3   ;;  %666 = vrot.lane.b32.xlu1 %v657_v5, %s1084_s20 }
 0x3bf   : > { %662 = vrot.lane.b32.xlu2 %v643_v4, %s1084_s20  ;;  %s851_s20 = scalar_lea.hbm %s1380_s10, %s961_s29 }
 0x3c0   : > { %s855_s25 = sshll.u32 %s851_s20, 4  ;;  %s856_s25 = int_to_ptr.hbm [resolvable:$true] %s855_s25 }
 0x3c1   : > { %s1030_s26 = sshra.s32 %s856_s25, 4  ;;  %s1031_s26 = int_to_ptr.hbm [resolvable:$true] %s1030_s26 }
 0x3c2   : > { %s1032_s27 = scalar_lea.hbm %s1031_s26, 4  ;;  %p1037_p0 = scmp.lt.s32.totalorder %s1031_s26, %s1380_s10 }
 0x3c3   : > { %p1033_p11 = scmp.ne.s32.totalorder %s1031_s26, %s1032_s27  ;;  %p1038_p1 = scmp.lt.s32.totalorder %s1036_s12, %s1032_s27 }
 0x3c4   : > { %v705_v21 = vpop.f32.mrf.mxu3  ;;  %v691_v26 = vpop.f32.mrf.mxu2 }
 0x3c5   : > { %p1034_p12 = pnand %p1033_p11, %p1178_p5  ;;  %p1039_p2 = por %p1038_p1, %p1037_p0 }
 0x3c6   : > { %810 = vperm.xlu0 %1007, %v807_v6  }
 0x3c7   : > { %712 = vperm.xlu2 %1006, %v708_v7   ;;  %p1035_p13 = pneg %p1034_p12 }
 0x3c9   : > { %p1040_p3 = pnand %p1039_p2, %p1035_p13 }
 0x419   : > { %v663_v8 = vpop.permute.xlu2 %662 }
 0x421   : > { %v713_v20 = vpop.permute.xlu2 %712 }
 0x428   : > { %v665_v12 = vpop.permute.xlu0 %664  ;;  %v661_v13 = vpop.permute.xlu1 %660 }
 0x429   : > { %v670_v14 = vsel %vm519_vm7, %v665_v12, %v661_v13  ;;  %v668_v17 = vsel %vm519_vm7, %v661_v13, %v665_v12 }
 0x42a   : > { %v690_v18 = vadd.f32 %v689_v11, %v670_v14  ;;  %v704_v19 = vadd.f32 %v703_v9, %v668_v17 }
 0x42c   : > { %v720_v23 = vadd.f32 %v713_v20, %v690_v18  ;;  %v721_v24 = vadd.f32 %v713_v20, %v704_v19 }
 0x42e   : > { %v724_v34 = vmax.f32 %v720_v23, 0.0  ;;  %v725_v35 = vmax.f32 %v721_v24, 0.0 }
 0x430   : > { %v667_v25 = vpop.permute.xlu1 %666  ;;  %v718_v33 = vpop.permute.xlu0 %717  ;;  %v733_v40 = vmul.f32 %v729_v31, %v724_v34  ;;  %v734_v41 = vmul.f32 %v730_v32, %v725_v35 }
 0x431   : > { %v671_v27 = vsel %vm519_vm7, %v667_v25, %v663_v8  ;;  %v669_v28 = vsel %vm519_vm7, %v663_v8, %v667_v25 }
 0x432   : > { %v692_v29 = vadd.f32 %v691_v26, %v671_v27  ;;  %v706_v30 = vadd.f32 %v705_v21, %v669_v28 }
 0x434   : > { %v722_v36 = vadd.f32 %v718_v33, %v692_v29  ;;  %v723_v37 = vadd.f32 %v718_v33, %v706_v30 }
 0x436   : > { %v726_v38 = vmax.f32 %v722_v36, 0.0  ;;  %v727_v39 = vmax.f32 %v723_v37, 0.0 }
 0x438   : > { %v735_v42 = vmul.f32 %v729_v31, %v726_v38  ;;  %v736_v43 = vmul.f32 %v730_v32, %v727_v39  ;;  %v811_v60 = vpop.permute.xlu0 %810 }
 0x43a   : > { %v739_v44 = vpack.c.bf16 %v736_v43, %v734_v41  ;;  %v738_v15 = vpack.c.bf16 %v735_v42, %v733_v40 }
 0x43c   : > { %753 = vmatpush.bf16.msra.mxu0 %v738_v15  ;;  %766 = vmatpush.bf16.msra.mxu1 %v739_v44 }
 0x43d   : > { %788 = vmatpush.bf16.msra.mxu2 %v738_v15  ;;  %801 = vmatpush.bf16.msra.mxu3 %v739_v44 }
 0x43f   : > { %949 = vmatmul.msk.bf16.vlgmr.msra.gmra.mxu0 %vm742_vm10, %v948_v45  ;;  %950 = vmatmul.msk.bf16.vlgmr.msra.gmra.mxu1 %vm742_vm10, %v948_v45 }
 0x440   : > { %951 = vmatmul.msk.bf16.vlgmr.msra.gmra.mxu2 %vm742_vm10, %v737_v16  ;;  %952 = vmatmul.msk.bf16.vlgmr.msra.gmra.mxu3 %vm742_vm10, %v737_v16 }
 0x4bc   : > { %v755_v46 = vpop.f32.mrf.mxu0  ;;  %v768_v47 = vpop.f32.mrf.mxu1 }
 0x4bd   : > { %772 = vrot.lane.b32.xlu1 %v755_v46, %s1080_s30  ;;  %774 = vrot.lane.b32.xlu2 %v768_v47, %s1080_s30  ;;  %s351_s30 = sand.u32 1, %s1070_s14  }
 0x4be   : > { %s919_s28 = sshll.u32 %s351_s30, 2  ;;  %s840_s17 = scalar_lea.sflag [#allocation3], %s351_s30 }
 0x4bf   : > { %s353_s11 = scalar_lea.vmem [#allocation2], %s919_s28 }
 0x4c0   : > { %s853_s21 = sshll.u32 %s353_s11, 4  ;;  %s854_s21 = int_to_ptr.vmem [resolvable:$true] %s853_s21 }
 0x4c3   : > { %v803_v50 = vpop.f32.mrf.mxu3  ;;  %v790_v51 = vpop.f32.mrf.mxu2 }
 0x4c4   : > { %v757_v48 = vpop.f32.mrf.mxu0  ;;  %v770_v49 = vpop.f32.mrf.mxu1 }
 0x4cb   : > { %v805_v52 = vpop.f32.mrf.mxu3  ;;  %v792_v53 = vpop.f32.mrf.mxu2 }
 0x517   : > { %v775_v54 = vpop.permute.xlu2 %774 }
 0x52f   : > { %v773_v55 = vpop.permute.xlu1 %772 }
 0x530   : > { %v777_v56 = vsel %vm384_vm0, %v775_v54, %v773_v55  ;;  %v776_v57 = vsel %vm384_vm0, %v773_v55, %v775_v54 }
 0x531   : > { %v791_v58 = vadd.f32 %v790_v51, %v777_v56  ;;  %v804_v59 = vadd.f32 %v803_v50, %v776_v57 }
 0x533   : > { %v813_v61 = vadd.f32 %v811_v60, %v791_v58  ;;  %v814_v62 = vadd.f32 %v811_v60, %v804_v59 }
 0x535   : > { %v815_v63 = vand.u32 2147483647, %v813_v61  ;;  %v816_v0 = vand.u32 2147483647, %v814_v62  ;;  %vm824_vm11 = vcmp.ge.f32.partialorder %v814_v62, 0.0  ;;  %vm823_vm12 = vcmp.ge.f32.partialorder %v813_v61, 0.0 }
 0x537   : > { %v817_v1 = vsub.f32 0.0, %v815_v63  ;;  %v818_v2 = vsub.f32 0.0, %v816_v0 }
 0x539   : > { %v819_v3 = vmul.f32 1.442695, %v817_v1  ;;  %v821_v4 = vmul.f32 1.442695, %v818_v2 }
 0x53b   : > { %1008 = vpow2.f32 %v819_v3 }
 0x53c   : > { %1010 = vpow2.f32 %v821_v4 }
 0x541   : > { %v1009_v5 = vpop.eup %1008 }
 0x542   : > { %v1011_v6 = vpop.eup %1010  ;;  %v827_v7 = vadd.f32 1.0, %v1009_v5  ;;  %v825_v13 = vsel %vm823_vm12, 1.0, %v1009_v5 }
 0x543   : > { %v828_v10 = vadd.f32 1.0, %v1011_v6  ;;  %v826_v11 = vsel %vm824_vm11, 1.0, %v1011_v6 }
 0x544   : > { %1012 = vrcp.f32 %v827_v7 }
 0x545   : > { %1014 = vrcp.f32 %v828_v10 }
 0x54a   : > { %v1013_v8 = vpop.eup %1012 }
 0x54b   : > { %v1015_v9 = vpop.eup %1014  ;;  %v831_v14 = vmul.f32 %v1013_v8, %v825_v13 }
 0x54c   : > { %v832_v12 = vmul.f32 %v1015_v9, %v826_v11 }
 0x54e   : > { %v835_v17 = vrot.slane %v832_v12, 6 }
 0x550   : > { %v836_v18 = vsel %vm425_vm2, %v831_v14, %v835_v17 }
 0x551   : > { %838 = vst [vmem:[%s353_s11] sm:$0xf] %v836_v18 }
 0x552   : > { %1043 = shalt.err (!%p1040_p3)
}
 0x553   : > { %962 = dma.vmem_to_hbm [thread:$0]  (%p1178_p5), %s854_s21, 64, %s856_s25, %s840_s17  }
 0x554 PF: > { %p968_p4 = scmp.ge.s32.totalorder %s1078_s16, 2  ;;  %s867_s30 = sand.u32 1, %s1066_s13  }
 0x555   : > { %s868_s11 = scalar_lea.sflag [#allocation3], %s867_s30 }
 0x556   : > { %p965_p7 = pnand %p968_p4, %p1182_p6 }
 0x558   : > { %p966_p8 = pneg %p965_p7 }
 0x55a   : > { %1061 = dma.done.wait (%p966_p8), %s868_s11, 64  }
 0x55b   : > { %1063 = vsyncadd (%p966_p8), %s868_s11, 4294967232  ;;  %p20_p9 = scmp.ge.s32.totalorder %s1165_s19, 4   ;;  %s1383_s13 = smov %s1070_s14 }
 0x55c   : > { %s1384_s14 = smov %s1074_s15  ;;  %s1385_s15 = smov %s1176_s22 }
 0x55d   : > { %s1386_s16 = smov %s1165_s19  ;;  %22 = sbr.rel (!%p20_p9) target bundleno = 3 (0x3), region = 102 }
 0x562   :  { %874 = vsyncpa [#allocation3], 1 }
 0x563   :  { %876 = vsyncpa [#allocation3 + $0x1], 1 }

</bundles_post_ra>
